<compile_context>
chip_gen: v5e
topology: v5e:2x2
jax: 0.10.0
libtpu: 0.0.40
codegen_flags: <defaults>
</compile_context>

<pallas_src>
import jax
import jax.numpy as jnp
from jax.experimental import pallas as pl
from jax.experimental.pallas import tpu as pltpu


# ----------------------------- Pallas kernel --------------------------------

def _pointwise_conv1d_kernel(x_ref, w_ref, b_ref, o_ref):
    # x: [TM, C_in], w: [C_in, C_out], b: [1, C_out]  ->  o: [TM, C_out]
    o_ref[...] = (
        jnp.dot(x_ref[...], w_ref[...], preferred_element_type=jnp.float32)
        + b_ref[...]
    ).astype(o_ref.dtype)


# ----------------------------- wrapper ---------------------------------------

def odefunc1_forward(t, x, conv_weight, conv_bias):
    """ODEfunc1.forward(t, x).

    x:           [B, L, C]  channels-last activations (C = d_model // 2)
    conv_weight: [C_out, C_in, 1]   (PyTorch Conv1d weight layout)
    conv_bias:   [C_out]
    t:           unused (ODE time), kept for signature parity.
    """
    del t  # unused by the module
    B, L, C = x.shape
    C_out = conv_weight.shape[0]

    # Conv1d(k=1):  out[b, l, co] = sum_ci x[b, l, ci] * W[co, ci] + bias[co]
    w = jnp.transpose(conv_weight[:, :, 0])          # [C_in, C_out]
    b = conv_bias.reshape(1, C_out)

    M = B * L
    x2 = x.reshape(M, C)

    # Tile the row axis; at toy sizes a single full block, at large sizes
    # 256-row parallel tiles (keeps VMEM small, uses both TCs on v7x).
    TM = 256 if M >= 256 else M
    n_tiles = pl.cdiv(M, TM)
    M_pad = n_tiles * TM
    if M_pad != M:
        x2 = jnp.pad(x2, ((0, M_pad - M), (0, 0)))

    out = pl.pallas_call(
        _pointwise_conv1d_kernel,
        out_shape=jax.ShapeDtypeStruct((M_pad, C_out), x.dtype),
        grid=(n_tiles,),
        in_specs=[
            pl.BlockSpec((TM, C), lambda i: (i, 0)),        # stream activations
            pl.BlockSpec((C, C_out), lambda i: (0, 0)),     # weight resident
            pl.BlockSpec((1, C_out), lambda i: (0, 0)),     # bias resident
        ],
        out_specs=pl.BlockSpec((TM, C_out), lambda i: (i, 0)),
        compiler_params=pltpu.CompilerParams(
            dimension_semantics=("parallel",)
        ),
    )(x2, w, b)

    return out[:M].reshape(B, L, C_out)


# ----------------------------- reference (pure JAX) ---------------------------

def _ref_forward(t, x, conv_weight, conv_bias):
    del t
    w = jnp.transpose(conv_weight[:, :, 0])   # [C_in, C_out]
    return x @ w + conv_bias


# ----------------------------- main -------------------------------------------

if __name__ == "__main__":
    # Small shapes consistent with the module: d_model=32 -> C = d_model // 2 = 16.
    B, L, d_model = 2, 8, 32
    C = d_model // 2

    key = jax.random.PRNGKey(0)
    kx, kw, kb, kt = jax.random.split(key, 4)
    x = jax.random.normal(kx, (B, L, C), jnp.float32)
    conv_weight = 0.1 * jax.random.normal(kw, (C, C, 1), jnp.float32)   # Conv1d weight
    conv_bias = 0.1 * jax.random.normal(kb, (C,), jnp.float32)
    t = jax.random.normal(kt, (), jnp.float32)   # unused ODE time argument

    out = odefunc1_forward(t, x, conv_weight, conv_bias)
    out = jax.block_until_ready(out)

    ref = _ref_forward(t, x, conv_weight, conv_bias)
    assert out.shape == (B, L, C)
    assert jnp.allclose(out, ref, atol=1e-5, rtol=1e-5), "mismatch vs reference"

    print("KERNEL_OK")
</pallas_src>

<mosaic_0001>
module attributes {stable_mosaic.version = 11 : i64} {
  func.func @_pointwise_conv1d_kernel(%arg0: i32, %arg1: memref<16x16xf32, #tpu.memory_space<vmem>>, %arg2: memref<16x16xf32, #tpu.memory_space<vmem>>, %arg3: memref<1x16xf32, #tpu.memory_space<vmem>>, %arg4: memref<16x16xf32, #tpu.memory_space<vmem>>) attributes {dimension_semantics = [#tpu.dimension_semantics<parallel>], iteration_bounds = array<i64: 1>, scalar_prefetch = 0 : i64, scratch_operands = 0 : i64, tpu.core_type = #tpu.core_type<tc>, window_params = [{transform_indices = @transform_0, window_bounds = array<i64: 16, 16>}, {pipeline_mode = #tpu.pipeline_mode<synchronous>, transform_indices = @transform_1, window_bounds = array<i64: 16, 16>}, {pipeline_mode = #tpu.pipeline_mode<synchronous>, transform_indices = @transform_2, window_bounds = array<i64: 1, 16>}, {transform_indices = @transform_3, window_bounds = array<i64: 16, 16>}]} {
    %c0 = arith.constant 0 : index
    %c0_0 = arith.constant 0 : index
    %0 = vector.load %arg1[%c0, %c0_0] : memref<16x16xf32, #tpu.memory_space<vmem>>, vector<16x16xf32>
    %c0_1 = arith.constant 0 : index
    %c0_2 = arith.constant 0 : index
    %1 = vector.load %arg2[%c0_1, %c0_2] : memref<16x16xf32, #tpu.memory_space<vmem>>, vector<16x16xf32>
    %cst = arith.constant dense<0.000000e+00> : vector<16x16xf32>
    %2 = tpu.matmul %0, %1, %cst {dimension_numbers = #tpu.dot_dimension_numbers<[1], [0], [0], [1], [0, 0, 1, 1], [], []>} : vector<16x16xf32>, vector<16x16xf32>, vector<16x16xf32> -> vector<16x16xf32>
    %c0_3 = arith.constant 0 : index
    %c0_4 = arith.constant 0 : index
    %3 = vector.load %arg3[%c0_3, %c0_4] : memref<1x16xf32, #tpu.memory_space<vmem>>, vector<1x16xf32>
    %4 = vector.broadcast %3 : vector<1x16xf32> to vector<16x16xf32>
    %5 = arith.addf %2, %4 : vector<16x16xf32>
    %c0_5 = arith.constant 0 : index
    %c0_6 = arith.constant 0 : index
    %6 = vector.load %arg4[%c0_5, %c0_6] : memref<16x16xf32, #tpu.memory_space<vmem>>, vector<16x16xf32>
    tpu.vector_store %arg4[%c0_5, %c0_6], %5 {strides = array<i32>} : memref<16x16xf32, #tpu.memory_space<vmem>>, vector<16x16xf32>,
    return
  }
  func.func @transform_0(%arg0: i32) -> (i32, i32) {
    %c0_i32 = arith.constant 0 : i32
    %c0_i32_0 = arith.constant 0 : i32
    return %arg0, %c0_i32 : i32, i32
  }
  func.func @transform_1(%arg0: i32) -> (i32, i32) {
    %c0_i32 = arith.constant 0 : i32
    %c0_i32_0 = arith.constant 0 : i32
    %c0_i32_1 = arith.constant 0 : i32
    return %c0_i32, %c0_i32_0 : i32, i32
  }
  func.func @transform_2(%arg0: i32) -> (i32, i32) {
    %c0_i32 = arith.constant 0 : i32
    %c0_i32_0 = arith.constant 0 : i32
    %c0_i32_1 = arith.constant 0 : i32
    return %c0_i32, %c0_i32_0 : i32, i32
  }
  func.func @transform_3(%arg0: i32) -> (i32, i32) {
    %c0_i32 = arith.constant 0 : i32
    %c0_i32_0 = arith.constant 0 : i32
    return %arg0, %c0_i32 : i32, i32
  }
}

</mosaic_0001>

<bundles_post_ra>
// kernel: tpu_custom_call.1
= control target key start
LH: loop header
LB: loop body
LE: loop exit
PB: predicated region body
PF: predicated region fallthrough
CT: control target
= control target key end

     0   :  { %8 = vsyncpa [#allocation3], 0  ;;  %s245_s0 = inlined_call_operand.hbm [shape: f32[16,16], index: 0, kind: input, shape index: {}]   ;;  %s246_s1 = inlined_call_operand.hbm [shape: f32[16,16], index: 1, kind: input, shape index: {}]   ;;  %s247_s2 = inlined_call_operand.vmem [shape: f32[1,16], index: 2, kind: input, shape index: {}]   ;;  %s248_s3 = inlined_call_operand.hbm [shape: f32[16,16], index: 3, kind: output, shape index: {}]  }
   0x1   :  { %9 = vsyncpa [#allocation6], 0 }
   0x2   :  { %10 = vsyncpa [#allocation4], 0  ;;  %s15_s14 = sshll.u32 %s245_s0, 4  ;;  %s195_s15 = smov [#allocation2]   ;;  %s16_s14 = int_to_ptr.hbm [resolvable:$true] %s15_s14 }
   0x3   :  { %s17_s16 = sshll.u32 %s195_s15, 4  ;;  %s28_s19 = sshll.u32 %s246_s1, 4  ;;  %s18_s16 = int_to_ptr.vmem [resolvable:$true] %s17_s16  ;;  %s29_s19 = int_to_ptr.hbm [resolvable:$true] %s28_s19 }
   0x4   :  { %s196_s20 = smov 128   ;;  %s197_s21 = smov 8  }
   0x5   :  { %23 = dma.hbm_to_vmem [thread:$0]  %s16_s14, 256, %s18_s16, [#allocation3], %s196_s20, %s196_s20, %s197_s21  }
   0x6   :  { %s198_s22 = smov [#allocation5]  }
   0x7   :  { %s30_s23 = sshll.u32 %s198_s22, 4  ;;  %s31_s23 = int_to_ptr.vmem [resolvable:$true] %s30_s23 }
   0x8   :  { %36 = dma.hbm_to_vmem [thread:$0]  %s29_s19, 256, %s31_s23, [#allocation6], %s196_s20, %s196_s20, %s197_s21  }
   0x9   :  { %189 = dma.done.wait [#allocation3], 256  }
   0xa   :  { %190 = vsyncadd [#allocation3], 4294967040 }
   0xb   :  { %191 = dma.done.wait [#allocation6], 256  }
   0xc   :  { %192 = vsyncadd [#allocation6], 4294967040  ;;  %v50_v0 = vld [vmem:[#allocation5 + $0x8] sm:$0xff]  ;;  %v49_v1 = vld [vmem:[#allocation5] sm:$0xff]  ;;  %vm55_vm0 = vcmask 130048   ;;  %s199_s24 = smov [#allocation7]  }
   0xd   :  { %76 = vmatpush.msra.mxu0 %v50_v0  ;;  %109 = vmatpush.msra.mxu1 %v50_v0  ;;  %v47_v2 = vld [vmem:[#allocation2] sm:$0xff]  ;;  %v48_v3 = vld [vmem:[#allocation2 + $0x8] sm:$0xff]  ;;  %s91_s25 = sshll.u32 %s199_s24, 4  ;;  %s93_s28 = sshll.u32 %s248_s3, 4  ;;  %s92_s25 = int_to_ptr.vmem [resolvable:$true] %s91_s25  ;;  %s94_s28 = int_to_ptr.hbm [resolvable:$true] %s93_s28 }
   0xe   :  { %v116_v4 = vld [vmem:[%s247_s2] ss:$0 sm:$0xff] }
   0xf   :  { %77 = vmatpush.msra.mxu0 %v49_v1  ;;  %110 = vmatpush.msra.mxu1 %v49_v1 }
  0x10   :  { %107 = vmatmul.msk.f32.vlgmr.msra.gmra.mxu0 %vm55_vm0, %v47_v2  ;;  %108 = vmatmul.msk.f32.vlgmr.msra.gmra.mxu1 %vm55_vm0, %v48_v3 }
  0x8d   :  { %v79_v5 = vpop.f32.mrf.mxu0  ;;  %v82_v6 = vpop.f32.mrf.mxu1 }
  0x8e   :  { %v80_v7 = vadd.f32 %v116_v4, %v79_v5  ;;  %v83_v8 = vadd.f32 %v116_v4, %v82_v6 }
  0x90   :  { %85 = vst.msk [vmem:[#allocation7] sm:$0xff] %vm55_vm0, %v80_v7 }
  0x91   :  { %86 = vst.msk [vmem:[#allocation7 + $0x8] sm:$0xff] %vm55_vm0, %v83_v8 }
  0x92   :  { %99 = dma.vmem_to_hbm [thread:$0]  %s92_s25, 256, %s94_s28, [#allocation4], %s196_s20, %s196_s20, %s197_s21  }
  0x93   :  { %193 = dma.done.wait [#allocation4], 256  }
  0x94   :  { %194 = vsyncadd [#allocation4], 4294967040 }
  0x95   :  { %104 = vsyncpa [#allocation3], 1 }
  0x96   :  { %105 = vsyncpa [#allocation6], 1 }
  0x97   :  { %106 = vsyncpa [#allocation4], 1 }

</bundles_post_ra>
